<compile_context>
chip_gen: v6e
topology: v6e:2x2x1
jax: 0.10.0
libtpu: 0.0.40
codegen_flags: <defaults>
</compile_context>

<pallas_src>
import functools

import jax
import jax.numpy as jnp
from jax import lax
from jax.experimental import pallas as pl
from jax.experimental.pallas import tpu as pltpu


def _gdl_kernel(x_ref, y_ref, out_ref, *, width, total_rows, block_rows,
                h_scale, w_scale):
    """One (BC, H*W) tile -> one fused, pre-normalized partial-sum block."""
    x = x_ref[...].astype(jnp.float32)
    y = y_ref[...].astype(jnp.float32)

    # Backward differences on the flattened (H*W) lane axis via XLU rolls:
    #   roll(x, 1)[k]     == x[k - 1]      -> within-row (W-direction) neighbor
    #   roll(x, width)[k] == x[k - width]  -> previous image row (H-direction)
    # Wrap-around / row-boundary positions are zeroed by the iota masks below.
    dxw = x - pltpu.roll(x, shift=1, axis=1)
    dyw = y - pltpu.roll(y, shift=1, axis=1)
    dxh = x - pltpu.roll(x, shift=width, axis=1)
    dyh = y - pltpu.roll(y, shift=width, axis=1)

    # Boundary masks built in-kernel (VPU has slack; removes two input
    # streams), pre-scaled by 1/count so both L1 means fuse into one sum.
    col = lax.broadcasted_iota(jnp.int32, x.shape, 1)
    h_wgt = jnp.where(col >= width, jnp.float32(h_scale), 0.0)      # drop image row 0
    w_wgt = jnp.where(col % width != 0, jnp.float32(w_scale), 0.0)  # drop col 0 per row

    term = (h_wgt * jnp.abs(jnp.abs(dxh) - jnp.abs(dyh))
            + w_wgt * jnp.abs(jnp.abs(dxw) - jnp.abs(dyw)))

    # Partial last block: rows past the true row count hold stale VMEM data
    # and MUST be excluded (jnp.where is NaN-safe, unlike multiplying by 0).
    if total_rows % block_rows != 0:
        row = lax.broadcasted_iota(jnp.int32, x.shape, 0)
        rows_valid = total_rows - pl.program_id(0) * block_rows
        term = jnp.where(row < rows_valid, term, 0.0)

    # Single lane-dense partial-sum output (one unmasked vreg-pair store).
    out_ref[...] = jnp.full(out_ref.shape, jnp.sum(term), dtype=jnp.float32)


def _choose_block_rows(nc, hw, itemsize):
    """Rows per grid step from a live-VMEM model of the whole step.

    Per tile element the step holds roughly:
      * 2 inputs x 2 pipeline buffers in the input dtype  -> 4 * itemsize B
      * ~6 full-tile f32 temporaries (x/y upcasts, 4 rolls / diff chains) -> 24 B
    """
    sublane = {4: 8, 2: 16, 1: 32}.get(itemsize, 8)   # native sublane tile
    budget_bytes = 32 * 1024 * 1024                    # fits v5e/v6e/v7x scoped VMEM
    per_elem_bytes = 4 * itemsize + 24
    max_elems = budget_bytes // per_elem_bytes
    bc = max(sublane, (max_elems // hw) // sublane * sublane)
    nc_pad = pl.cdiv(nc, sublane) * sublane
    return int(min(bc, nc_pad)), per_elem_bytes


def gdl_loss(x, y):
    """Pallas implementation of GDL.forward(x, y). x, y: (N, C, H, W)."""
    assert x.shape == y.shape and x.ndim == 4
    n, c, h, w = x.shape
    nc, hw = n * c, h * w

    x2 = x.reshape(nc, hw)
    y2 = y.reshape(nc, hw)

    bc, per_elem_bytes = _choose_block_rows(nc, hw, x2.dtype.itemsize)
    num_blocks = pl.cdiv(nc, bc)

    # True (unpadded) element counts of the two TV maps.
    h_count = n * c * (h - 1) * w
    w_count = n * c * h * (w - 1)

    # Explicit scoped-VMEM budget from the same footprint model (+ headroom),
    # capped well under v7x's 64 MiB physical VMEM.
    footprint = bc * hw * per_elem_bytes + (2 << 20)
    vmem_limit = int(min(max(footprint, 16 << 20), 48 << 20))

    kernel = functools.partial(
        _gdl_kernel, width=w, total_rows=nc, block_rows=bc,
        h_scale=1.0 / float(h_count), w_scale=1.0 / float(w_count))

    partial_sums = pl.pallas_call(
        kernel,
        out_shape=jax.ShapeDtypeStruct((num_blocks, 8, 128), jnp.float32),
        grid=(num_blocks,),
        in_specs=[
            pl.BlockSpec((bc, hw), lambda i: (i, 0)),
            pl.BlockSpec((bc, hw), lambda i: (i, 0)),
        ],
        out_specs=pl.BlockSpec((1, 8, 128), lambda i: (i, 0, 0)),
        compiler_params=pltpu.CompilerParams(
            dimension_semantics=("parallel",),
            vmem_limit_bytes=vmem_limit),
    )(x2, y2)

    # Tiny final reduction: partial sums are already normalized and fused.
    return jnp.sum(partial_sums[:, 0, 0])


def _gdl_reference(x, y):
    x = x.astype(jnp.float32)
    y = y.astype(jnp.float32)
    x_h = jnp.abs(x[:, :, 1:, :] - x[:, :, :-1, :])
    y_h = jnp.abs(y[:, :, 1:, :] - y[:, :, :-1, :])
    x_w = jnp.abs(x[:, :, :, 1:] - x[:, :, :, :-1])
    y_w = jnp.abs(y[:, :, :, 1:] - y[:, :, :, :-1])
    return jnp.mean(jnp.abs(x_h - y_h)) + jnp.mean(jnp.abs(x_w - y_w))


if __name__ == "__main__":
    key = jax.random.PRNGKey(0)
    kx, ky = jax.random.split(key)
    # Small NCHW inputs consistent with the module's forward.
    x = jax.random.normal(kx, (2, 4, 16, 16), dtype=jnp.float32)
    y = jax.random.normal(ky, (2, 4, 16, 16), dtype=jnp.float32)

    out = gdl_loss(x, y)
    jax.block_until_ready(out)

    ref = _gdl_reference(x, y)
    assert jnp.allclose(out, ref, rtol=1e-5, atol=1e-5), (out, ref)

    print("KERNEL_OK")
</pallas_src>

<mosaic_0001>
module attributes {stable_mosaic.version = 11 : i64} {
  func.func @_gdl_kernel(%arg0: i32, %arg1: memref<8x256xf32, #tpu.memory_space<vmem>>, %arg2: memref<8x256xf32, #tpu.memory_space<vmem>>, %arg3: memref<1x8x128xf32, #tpu.memory_space<vmem>>) attributes {dimension_semantics = [#tpu.dimension_semantics<parallel>], iteration_bounds = array<i64: 1>, scalar_prefetch = 0 : i64, scratch_operands = 0 : i64, tpu.core_type = #tpu.core_type<tc>, window_params = [{transform_indices = @transform_0, window_bounds = array<i64: 8, 256>}, {transform_indices = @transform_1, window_bounds = array<i64: 8, 256>}, {transform_indices = @transform_2, window_bounds = array<i64: 1, 8, 128>}]} {
    %c0 = arith.constant 0 : index
    %c0_0 = arith.constant 0 : index
    %0 = vector.load %arg1[%c0, %c0_0] : memref<8x256xf32, #tpu.memory_space<vmem>>, vector<8x256xf32>
    %c0_1 = arith.constant 0 : index
    %c0_2 = arith.constant 0 : index
    %1 = vector.load %arg2[%c0_1, %c0_2] : memref<8x256xf32, #tpu.memory_space<vmem>>, vector<8x256xf32>
    %c1_i32 = arith.constant 1 : i32
    %2 = tpu.dynamic_rotate %0 by %c1_i32 dim 1 : vector<8x256xf32>, i32 -> vector<8x256xf32>
    %3 = arith.subf %0, %2 : vector<8x256xf32>
    %c1_i32_3 = arith.constant 1 : i32
    %4 = tpu.dynamic_rotate %1 by %c1_i32_3 dim 1 : vector<8x256xf32>, i32 -> vector<8x256xf32>
    %5 = arith.subf %1, %4 : vector<8x256xf32>
    %c16_i32 = arith.constant 16 : i32
    %6 = tpu.dynamic_rotate %0 by %c16_i32 dim 1 : vector<8x256xf32>, i32 -> vector<8x256xf32>
    %7 = arith.subf %0, %6 : vector<8x256xf32>
    %c16_i32_4 = arith.constant 16 : i32
    %8 = tpu.dynamic_rotate %1 by %c16_i32_4 dim 1 : vector<8x256xf32>, i32 -> vector<8x256xf32>
    %9 = arith.subf %1, %8 : vector<8x256xf32>
    %10 = tpu.iota {dimensions = array<i32: 1>} : vector<8x256xi32>
    %c16_i32_5 = arith.constant 16 : i32
    %11 = vector.broadcast %c16_i32_5 : i32 to vector<8x256xi32>
    %12 = arith.cmpi sge, %10, %11 : vector<8x256xi32>
    %cst = arith.constant 5.2083336E-4 : f32
    %cst_6 = arith.constant 0.000000e+00 : f32
    %13 = vector.broadcast %cst : f32 to vector<8x256xf32>
    %14 = vector.broadcast %cst_6 : f32 to vector<8x256xf32>
    %15 = arith.select %12, %13, %14 : vector<8x256xi1>, vector<8x256xf32>
    %c16_i32_7 = arith.constant 16 : i32
    %c0_i32 = arith.constant 0 : i32
    %16 = arith.cmpi eq, %c16_i32_7, %c0_i32 : i32
    %c1_i32_8 = arith.constant 1 : i32
    %17 = arith.select %16, %c1_i32_8, %c16_i32_7 : i32
    %18 = vector.broadcast %17 : i32 to vector<8x256xi32>
    %19 = arith.remsi %10, %18 : vector<8x256xi32>
    %c0_i32_9 = arith.constant 0 : i32
    %20 = vector.broadcast %c0_i32_9 : i32 to vector<8x256xi32>
    %21 = arith.cmpi ne, %19, %20 : vector<8x256xi32>
    %c0_i32_10 = arith.constant 0 : i32
    %22 = vector.broadcast %c0_i32_10 : i32 to vector<8x256xi32>
    %23 = arith.cmpi slt, %19, %22 : vector<8x256xi32>
    %c0_i32_11 = arith.constant 0 : i32
    %24 = arith.cmpi slt, %17, %c0_i32_11 : i32
    %25 = vector.broadcast %24 : i1 to vector<8x256xi1>
    %26 = vector.broadcast %25 : vector<8x256xi1> to vector<8x256xi1>
    %27 = arith.xori %23, %26 : vector<8x256xi1>
    %28 = arith.andi %27, %21 : vector<8x256xi1>
    %29 = vector.broadcast %17 : i32 to vector<8x256xi32>
    %30 = arith.addi %19, %29 : vector<8x256xi32>
    %31 = arith.select %28, %30, %19 : vector<8x256xi1>, vector<8x256xi32>
    %c0_i32_12 = arith.constant 0 : i32
    %32 = vector.broadcast %c0_i32_12 : i32 to vector<8x256xi32>
    %33 = arith.cmpi ne, %31, %32 : vector<8x256xi32>
    %cst_13 = arith.constant 5.2083336E-4 : f32
    %cst_14 = arith.constant 0.000000e+00 : f32
    %34 = vector.broadcast %cst_13 : f32 to vector<8x256xf32>
    %35 = vector.broadcast %cst_14 : f32 to vector<8x256xf32>
    %36 = arith.select %33, %34, %35 : vector<8x256xi1>, vector<8x256xf32>
    %37 = math.absf %7 : vector<8x256xf32>
    %38 = math.absf %9 : vector<8x256xf32>
    %39 = arith.subf %37, %38 : vector<8x256xf32>
    %40 = math.absf %39 : vector<8x256xf32>
    %41 = arith.mulf %15, %40 : vector<8x256xf32>
    %42 = math.absf %3 : vector<8x256xf32>
    %43 = math.absf %5 : vector<8x256xf32>
    %44 = arith.subf %42, %43 : vector<8x256xf32>
    %45 = math.absf %44 : vector<8x256xf32>
    %46 = arith.mulf %36, %45 : vector<8x256xf32>
    %47 = arith.addf %41, %46 : vector<8x256xf32>
    %48 = vector.shape_cast %47 : vector<8x256xf32> to vector<1x8x256xf32>
    %cst_15 = arith.constant dense<0.000000e+00> : vector<1xf32>
    %49 = vector.multi_reduction <add>, %48, %cst_15 [1, 2] : vector<1x8x256xf32> to vector<1xf32>
    %50 = vector.shape_cast %49 : vector<1xf32> to vector<1x1x1xf32>
    %51 = vector.extract %50[0, 0, 0] : f32 from vector<1x1x1xf32>
    %52 = vector.broadcast %51 : f32 to vector<1x8x128xf32>
    %c0_16 = arith.constant 0 : index
    %c0_17 = arith.constant 0 : index
    %c0_18 = arith.constant 0 : index
    %53 = vector.load %arg3[%c0_16, %c0_17, %c0_18] : memref<1x8x128xf32, #tpu.memory_space<vmem>>, vector<1x8x128xf32>
    tpu.vector_store %arg3[%c0_16, %c0_17, %c0_18], %52 {strides = array<i32>} : memref<1x8x128xf32, #tpu.memory_space<vmem>>, vector<1x8x128xf32>,
    return
  }
  func.func @transform_0(%arg0: i32) -> (i32, i32) {
    %c0_i32 = arith.constant 0 : i32
    %c0_i32_0 = arith.constant 0 : i32
    return %arg0, %c0_i32 : i32, i32
  }
  func.func @transform_1(%arg0: i32) -> (i32, i32) {
    %c0_i32 = arith.constant 0 : i32
    %c0_i32_0 = arith.constant 0 : i32
    return %arg0, %c0_i32 : i32, i32
  }
  func.func @transform_2(%arg0: i32) -> (i32, i32, i32) {
    %c0_i32 = arith.constant 0 : i32
    %c0_i32_0 = arith.constant 0 : i32
    %c0_i32_1 = arith.constant 0 : i32
    return %arg0, %c0_i32, %c0_i32_0 : i32, i32, i32
  }
}

</mosaic_0001>

<bundles_post_ra>
// kernel: tpu_custom_call.1
= control target key start
LH: loop header
LB: loop body
LE: loop exit
PB: predicated region body
PF: predicated region fallthrough
CT: control target
= control target key end

     0   :  { %7 = vsyncpa [#allocation3], 0  ;;  %s267_s0 = inlined_call_operand.hbm [shape: f32[8,256], index: 0, kind: input, shape index: {}]   ;;  %s268_s1 = inlined_call_operand.hbm [shape: f32[8,256], index: 1, kind: input, shape index: {}]   ;;  %s269_s2 = inlined_call_operand.hbm [shape: f32[1,8,128], index: 2, kind: output, shape index: {}]  }
   0x1   :  { %8 = vsyncpa [#allocation6], 0 }
   0x2   :  { %9 = vsyncpa [#allocation4], 0  ;;  %s233_s9 = smov [#allocation2]   ;;  %s234_s11 = smov [#allocation5]  }
   0x3   :  { %s16_s10 = sshll.u32 %s233_s9, 4  ;;  %s26_s12 = sshll.u32 %s234_s11, 4  ;;  %s17_s10 = int_to_ptr.vmem [resolvable:$true] %s16_s10  ;;  %s27_s12 = int_to_ptr.vmem [resolvable:$true] %s26_s12 }
   0x4   :  { %s175_s13 = scalar_lea.vmem %s17_s10, 256  ;;  %p180_p1 = scmp.lt.s32.totalorder %s17_s10, %s17_s10 }
   0x5   :  { %p176_p0 = scmp.ne.s32.totalorder %s17_s10, %s175_s13  ;;  %p181_p2 = scmp.lt.s32.totalorder %s175_s13, %s175_s13 }
   0x7   :  { %p182_p3 = por %p181_p2, %p180_p1 }
   0x9   :  { %p183_p4 = pnand %p182_p3, %p176_p0 }
   0xb   :  { %186 = shalt.err (!%p183_p4)
}
   0xc   :  { %19 = dma.hbm_to_vmem [thread:$0]  %s267_s0, 256, %s17_s10, [#allocation3]  }
   0xd   :  { %s195_s16 = scalar_lea.vmem %s27_s12, 256  ;;  %p200_p6 = scmp.lt.s32.totalorder %s27_s12, %s27_s12 }
   0xe   :  { %p196_p5 = scmp.ne.s32.totalorder %s27_s12, %s195_s16  ;;  %p201_p7 = scmp.lt.s32.totalorder %s195_s16, %s195_s16 }
  0x10   :  { %p202_p8 = por %p201_p7, %p200_p6 }
  0x12   :  { %p203_p9 = pnand %p202_p8, %p196_p5 }
  0x14   :  { %206 = shalt.err (!%p203_p9)
}
  0x15   :  { %29 = dma.hbm_to_vmem [thread:$0]  %s268_s1, 256, %s27_s12, [#allocation6]  }
  0x16   :  { %227 = dma.done.wait [#allocation3], 256  }
  0x17   :  { %228 = vsyncadd [#allocation3], 4294967040 }
  0x18   :  { %229 = dma.done.wait [#allocation6], 256  }
  0x19   :  { %230 = vsyncadd [#allocation6], 4294967040  ;;  %v38_v0 = vld [vmem:[#allocation5] sm:$0xff]  ;;  %v36_v1 = vld [vmem:[#allocation2] sm:$0xff]  ;;  %s235_s19 = smov 1   ;;  %s236_s0 = smov 16   ;;  %v44_v4 = vlaneseq }
  0x1a   :  { %51 = vrot.lane.b32.xlu1 %v38_v0, %s235_s19  ;;  %40 = vrot.lane.b32.xlu0 %v36_v1, %s235_s19  ;;  %v39_v2 = vld [vmem:[#allocation5 + $0x8] sm:$0xff]  ;;  %v37_v3 = vld [vmem:[#allocation2 + $0x8] sm:$0xff]  ;;  %v237_v47 = vmov 0.0   ;;  %s238_s1 = smov [#allocation7]  }
  0x1b   :  { %v45_v5 = vand.u32 127, %v44_v4  ;;  %s149_s20 = sshll.u32 %s238_s1, 4  ;;  %s150_s20 = int_to_ptr.vmem [resolvable:$true] %s149_s20 }
  0x1c   :  { %s207_s22 = scalar_lea.vmem %s150_s20, 128  ;;  %p212_p11 = scmp.lt.s32.totalorder %s150_s20, %s150_s20 }
  0x1d   :  { %vm46_vm0 = vcmp.lt.s32.totalorder %v45_v5, 1  ;;  %vm63_vm1 = vcmp.lt.s32.totalorder %v45_v5, 16  ;;  %v76_v18 = vadd.s32 128, %v45_v5  ;;  %v85_v28 = vand.u32 15, %v45_v5  ;;  %p208_p10 = scmp.ne.s32.totalorder %s150_s20, %s207_s22  ;;  %p213_p12 = scmp.lt.s32.totalorder %s207_s22, %s207_s22 }
  0x1e   :  { %53 = vrot.lane.b32.xlu1 %v39_v2, %s235_s19  ;;  %42 = vrot.lane.b32.xlu0 %v37_v3, %s235_s19  ;;  %vm77_vm2 = vcmp.ge.s32.totalorder %v45_v5, 16 }
  0x1f   :  { %v92_v29 = vand.u32 15, %v76_v18  ;;  %vm105_vm3 = vcmp.ne.s32.totalorder %v85_v28, 0  ;;  %v79_v48 = vsel %vm77_vm2, 0.00052083336, %v237_v47  ;;  %p214_p13 = por %p213_p12, %p212_p11 }
  0x20   :  { %v107_v49 = vsel %vm105_vm3, 0.00052083336, %v237_v47 }
  0x21   :  { %vm106_vm4 = vcmp.ne.s32.totalorder %v92_v29, 0  ;;  %p215_p0 = pnand %p214_p13, %p208_p10 }
  0x22   :  { %61 = vrot.lane.b32.xlu1 %v37_v3, %s236_s0  ;;  %59 = vrot.lane.b32.xlu0 %v36_v1, %s236_s0  ;;  %v108_v50 = vsel %vm106_vm4, 0.00052083336, %v237_v47 }
  0x26   :  { %70 = vrot.lane.b32.xlu1 %v39_v2, %s236_s0  ;;  %68 = vrot.lane.b32.xlu0 %v38_v0, %s236_s0 }
  0x8c   :  { %v52_v6 = vpop.permute.xlu1 %51  ;;  %v41_v7 = vpop.permute.xlu0 %40 }
  0x90   :  { %v54_v8 = vpop.permute.xlu1 %53  ;;  %v43_v9 = vpop.permute.xlu0 %42 }
  0x91   :  { %v55_v10 = vsel %vm46_vm0, %v52_v6, %v54_v8  ;;  %v56_v11 = vsel %vm46_vm0, %v54_v8, %v52_v6  ;;  %v47_v12 = vsel %vm46_vm0, %v41_v7, %v43_v9  ;;  %v48_v13 = vsel %vm46_vm0, %v43_v9, %v41_v7 }
  0x92   :  { %v57_v14 = vsub.f32 %v38_v0, %v56_v11  ;;  %v58_v15 = vsub.f32 %v39_v2, %v55_v10  ;;  %v49_v16 = vsub.f32 %v36_v1, %v48_v13  ;;  %v50_v17 = vsub.f32 %v37_v3, %v47_v12 }
  0x94   :  { %v62_v19 = vpop.permute.xlu1 %61  ;;  %v60_v20 = vpop.permute.xlu0 %59  ;;  %v121_v21 = vand.u32 2147483647, %v57_v14  ;;  %v122_v24 = vand.u32 2147483647, %v58_v15  ;;  %v119_v25 = vand.u32 2147483647, %v49_v16 }
  0x95   :  { %v64_v22 = vsel %vm63_vm1, %v60_v20, %v62_v19  ;;  %v65_v23 = vsel %vm63_vm1, %v62_v19, %v60_v20  ;;  %v120_v26 = vand.u32 2147483647, %v50_v17 }
  0x96   :  { %v66_v27 = vsub.f32 %v36_v1, %v65_v23  ;;  %v67_v30 = vsub.f32 %v37_v3, %v64_v22  ;;  %v123_v35 = vsub.f32 %v119_v25, %v121_v21 }
  0x97   :  { %v124_v36 = vsub.f32 %v120_v26, %v122_v24 }
  0x98   :  { %v71_v31 = vpop.permute.xlu1 %70  ;;  %v69_v32 = vpop.permute.xlu0 %68  ;;  %v109_v39 = vand.u32 2147483647, %v66_v27  ;;  %v110_v40 = vand.u32 2147483647, %v67_v30  ;;  %v125_v43 = vand.u32 2147483647, %v123_v35 }
  0x99   :  { %v72_v33 = vsel %vm63_vm1, %v69_v32, %v71_v31  ;;  %v73_v34 = vsel %vm63_vm1, %v71_v31, %v69_v32  ;;  %v126_v44 = vand.u32 2147483647, %v124_v36 }
  0x9a   :  { %v74_v37 = vsub.f32 %v38_v0, %v73_v34  ;;  %v75_v38 = vsub.f32 %v39_v2, %v72_v33  ;;  %v127_v55 = vmul.f32 %v125_v43, %v107_v49 }
  0x9b   :  { %v128_v56 = vmul.f32 %v126_v44, %v108_v50 }
  0x9c   :  { %v111_v41 = vand.u32 2147483647, %v74_v37  ;;  %v112_v42 = vand.u32 2147483647, %v75_v38 }
  0x9e   :  { %v113_v45 = vsub.f32 %v109_v39, %v111_v41  ;;  %v114_v46 = vsub.f32 %v110_v40, %v112_v42 }
  0xa0   :  { %v115_v51 = vand.u32 2147483647, %v113_v45  ;;  %v116_v52 = vand.u32 2147483647, %v114_v46 }
  0xa2   :  { %v117_v53 = vmul.f32 %v115_v51, %v79_v48  ;;  %v118_v54 = vmul.f32 0.00052083336, %v116_v52 }
  0xa4   :  { %v129_v57 = vadd.f32 %v127_v55, %v117_v53  ;;  %v130_v58 = vadd.f32 %v128_v56, %v118_v54 }
  0xa6   :  { %v131_v59 = vadd.f32 %v130_v58, %v129_v57 }
  0xa8   :  { %132 = vadd.xlane.f32.xlu0 %v131_v59 }
 0x131   :  { %v133_v60 = vpop.xlane.xlu0 %132 }
 0x132   :  { %v134_v61 = vrot.slane %v133_v60, 4 }
 0x134   :  { %v135_v62 = vadd.f32 %v134_v61, %v133_v60 }
 0x136   :  { %v136_v63 = vrot.slane %v135_v62, 2 }
 0x138   :  { %v137_v0 = vadd.f32 %v136_v63, %v135_v62 }
 0x13a   :  { %v138_v1 = vrot.slane %v137_v0, 1 }
 0x13c   :  { %v139_v2 = vadd.f32 %v138_v1, %v137_v0 }
 0x13e   :  { %159 = vpush %v139_v2 }
 0x16f   :  { %s160_s21 = spop %159 }
 0x170   :  { %v141_v3 = vstv %s160_s21 }
 0x171   :  { %142 = vst [vmem:[#allocation7] sm:$0xff] %v141_v3 }
 0x172   :  { %218 = shalt.err (!%p215_p0)
}
 0x173   :  { %152 = dma.vmem_to_hbm [thread:$0]  %s150_s20, 128, %s269_s2, [#allocation4]  }
 0x174   :  { %231 = dma.done.wait [#allocation4], 128  }
 0x175   :  { %232 = vsyncadd [#allocation4], 4294967168 }
 0x176   :  { %156 = vsyncpa [#allocation3], 1 }
 0x177   :  { %157 = vsyncpa [#allocation6], 1 }
 0x178   :  { %158 = vsyncpa [#allocation4], 1 }

</bundles_post_ra>
